<compile_context>
chip_gen: v5e
topology: v5e:2x2
jax: 0.10.0
libtpu: 0.0.40
codegen_flags: <defaults>
</compile_context>

<pallas_src>
from typing import NamedTuple

import jax
import jax.numpy as jnp
from jax.experimental import pallas as pl
from jax.experimental.pallas import tpu as pltpu

_MIB = 1024 * 1024


# ----------------------------------------------------------------------------
# Kernel
# ----------------------------------------------------------------------------
def _ffn_kernel(x_ref, wgu_ref, wd_ref, o_ref, acc_ref):
    # x_ref:   (tm, dim)      token tile (same block across the hidden axis)
    # wgu_ref: (dim, 2*tk_h)  fused [gate_k | up_k] hidden chunk
    # wd_ref:  (tk_h, dim)    down_proj hidden chunk
    # o_ref:   (tm, dim)      output tile (same block across the hidden axis)
    # acc_ref: (tm, dim) f32  accumulator scratch, resident across the k axis
    k = pl.program_id(1)

    @pl.when(k == 0)
    def _init():
        acc_ref[...] = jnp.zeros_like(acc_ref)

    tk_h = wgu_ref.shape[-1] // 2

    x = x_ref[...]
    # One fused matmul for gate+up: (tm, dim) @ (dim, 2*tk_h) -> (tm, 2*tk_h)
    gu = jnp.dot(x, wgu_ref[...], preferred_element_type=jnp.float32)
    g = gu[:, :tk_h]
    u = gu[:, tk_h:]
    # SiLU in f32 (sigmoid lowers to the EUP slot, nearly free behind the MXU).
    h = (g * jax.nn.sigmoid(g)) * u

    # Partial down-projection for this hidden chunk, accumulated in f32.
    acc_ref[...] += jnp.dot(
        h.astype(wd_ref.dtype), wd_ref[...], preferred_element_type=jnp.float32
    )

    @pl.when(k == pl.num_programs(1) - 1)
    def _finalize():
        o_ref[...] = acc_ref[...].astype(o_ref.dtype)


# ----------------------------------------------------------------------------
# VMEM-budget-driven tile selection
# ----------------------------------------------------------------------------
def _round_up(x, m):
    return ((x + m - 1) // m) * m


def _vmem_capacity_bytes():
    try:
        cap = int(pltpu.get_tpu_info().vmem_capacity_bytes)
        if cap > 0:
            return cap
    except Exception:
        pass
    return 64 * _MIB  # conservative default (v7x per-TensorCore VMEM)


def _working_set_bytes(tm, tk_h, dim, w_bytes, x_bytes, o_bytes, nbuf_w):
    """Everything live in VMEM for one grid step, including the compiler-
    materialized f32 intermediates (gu, h) and the cast copy of h."""
    wgu = nbuf_w * dim * (2 * tk_h) * w_bytes          # fused gate|up chunks
    wd = nbuf_w * tk_h * dim * w_bytes                 # down-proj chunks
    xio = 2 * tm * dim * x_bytes + 2 * tm * dim * o_bytes   # x / out tiles (dbl-buf)
    acc = tm * dim * 4                                 # f32 accumulator scratch
    inter = tm * (2 * tk_h) * 4 + tm * tk_h * 4 + tm * tk_h * w_bytes
    return wgu + wd + xio + acc + inter


def _tk_candidates(hidden):
    # Hidden chunk must be a multiple of 128 (lane tile) so the gate/up split
    # of the fused matmul output is lane-tile aligned; full `hidden` is the
    # small-model fallback (block == full dim is always legal).
    cands = [c for c in (2048, 1024, 512, 384, 256, 128) if hidden % c == 0]
    return cands if cands else [hidden]


def _tm_candidates(m_pad8):
    cands = [c for c in (4096, 2048, 1024, 512, 256, 128) if c <= m_pad8]
    return cands if cands else [m_pad8]


def _select_tiles(m, dim, hidden, w_bytes, x_bytes, o_bytes, budget,
                  tm_override=None, tk_override=None):
    """Pick the largest (tm, tk_h, n_weight_buffers) whose working set fits."""
    m_pad8 = _round_up(max(int(m), 1), 8)
    decode_like = m_pad8 <= 128

    tk_cands = [int(tk_override)] if tk_override is not None else _tk_candidates(hidden)
    if tm_override is not None:
        tm_cands = [_round_up(int(tm_override), 8)]
    else:
        tm_cands = _tm_candidates(m_pad8)
    nbuf_opts = (3, 2) if decode_like else (2,)

    chosen = None
    # Prefer the largest token tile: HBM weight traffic scales with m/tm.
    for tm in tm_cands:
        if tm_override is None:
            pad_waste = _round_up(m_pad8, tm) - m_pad8
            if pad_waste * 8 > m_pad8 and tm > 128:
                continue  # would mostly compute padding
        for tk in tk_cands:
            for nbuf in nbuf_opts:
                if _working_set_bytes(tm, tk, dim, w_bytes, x_bytes, o_bytes,
                                      nbuf) <= budget:
                    chosen = (tm, tk, nbuf)
                    break
            if chosen:
                break
        if chosen:
            break
    if chosen is None:  # nothing fits: take the smallest candidates anyway
        chosen = (min(tm_cands[-1], m_pad8), tk_cands[-1], 2)
    tm, tk_h, nbuf = chosen

    # v7x shards the "parallel" token axis across its 2 TensorCores: give
    # compute-heavy shapes at least 2 token tiles.  Decode stays single-tile
    # so the weights are streamed from HBM exactly once.
    if tm_override is None and not decode_like and tm >= 256:
        if _round_up(m_pad8, tm) // tm < 2:
            tm //= 2

    m_pad = _round_up(m_pad8, tm)
    return tm, tk_h, nbuf, m_pad


# ----------------------------------------------------------------------------
# One-time weight preparation (do NOT re-run per forward pass)
# ----------------------------------------------------------------------------
class PreparedFFNWeights(NamedTuple):
    w_gu: jax.Array   # (dim, 2*hidden); chunk k lives in lanes [2*k*tk_h, 2*(k+1)*tk_h)
    w_d_t: jax.Array  # (hidden, dim)
    tk_h: int         # chunk size baked into the w_gu interleave


def prepare_ffn_weights(w_gate, w_up, w_down, *, tk_h=None):
    """Transpose PyTorch (out, in) Linear weights to (in, out) and fuse gate/up
    so hidden chunk k of both lives in one contiguous lane block.  Records the
    chunk size so a mismatched forward call cannot silently compute garbage."""
    hidden, dim = w_gate.shape
    assert w_up.shape == (hidden, dim) and w_down.shape == (dim, hidden)

    if tk_h is None:
        budget = int(_vmem_capacity_bytes() * 0.80)
        w_bytes = jnp.dtype(w_gate.dtype).itemsize
        tk_h = _tk_candidates(hidden)[-1]
        for cand in _tk_candidates(hidden):
            if _working_set_bytes(256, cand, dim, w_bytes, w_bytes, w_bytes, 2) <= budget:
                tk_h = cand
                break
    tk_h = int(tk_h)
    assert hidden % tk_h == 0, "tk_h must divide the hidden dim"

    nk = hidden // tk_h
    wg_t = w_gate.T.reshape(dim, nk, tk_h)
    wu_t = w_up.T.reshape(dim, nk, tk_h)
    w_gu = jnp.concatenate([wg_t, wu_t], axis=2).reshape(dim, 2 * hidden)
    return PreparedFFNWeights(w_gu=w_gu, w_d_t=w_down.T, tk_h=tk_h)


# ----------------------------------------------------------------------------
# Forward wrapper
# ----------------------------------------------------------------------------
def feed_forward(x, weights: PreparedFFNWeights, *, tm=None):
    """x: (..., dim). weights: output of prepare_ffn_weights()."""
    orig_shape = x.shape
    dim = orig_shape[-1]
    hidden = weights.w_d_t.shape[0]
    tk_h = int(weights.tk_h)
    assert weights.w_gu.shape == (dim, 2 * hidden)
    assert hidden % tk_h == 0

    x2d = x.reshape(-1, dim)
    m = x2d.shape[0]

    w_bytes = jnp.dtype(weights.w_gu.dtype).itemsize
    x_bytes = jnp.dtype(x2d.dtype).itemsize
    o_bytes = x_bytes

    cap = _vmem_capacity_bytes()
    budget = int(cap * 0.80)  # headroom for compiler internal scratch
    tm, tk_h, nbuf_w, m_pad = _select_tiles(
        m, dim, hidden, w_bytes, x_bytes, o_bytes, budget,
        tm_override=tm, tk_override=tk_h)
    nk = hidden // tk_h
    n_tiles_m = m_pad // tm

    # Pad tokens to a multiple of the tile (keeps stores sublane-aligned too).
    if m_pad != m:
        x2d = jnp.pad(x2d, ((0, m_pad - m), (0, 0)))

    ws = _working_set_bytes(tm, tk_h, dim, w_bytes, x_bytes, o_bytes, nbuf_w)
    # Requested VMEM limit: cover the working set, leave chip headroom.
    # v7x (64 MiB) keeps ~8 MiB free; v5e/v6e (128 MiB) use up to ~85%.
    limit_cap = cap - 8 * _MIB if cap <= 64 * _MIB else int(cap * 0.85)
    vmem_limit = int(min(limit_cap, max(32 * _MIB, int(1.25 * ws) + 4 * _MIB)))

    # Deeper weight buffering only helps when the reduction axis is long enough.
    use_deep = nbuf_w > 2 and nk >= 3

    def _weight_spec(block_shape, index_map):
        if use_deep:
            try:
                return pl.BlockSpec(block_shape, index_map,
                                    pipeline_mode=pl.Buffered(nbuf_w))
            except Exception:  # pipeline_mode unsupported -> default 2-deep
                pass
        return pl.BlockSpec(block_shape, index_map)

    cost = pl.CostEstimate(
        flops=6 * m_pad * dim * hidden,
        transcendentals=m_pad * hidden,
        # Weights are re-streamed from HBM once per token tile.
        bytes_accessed=int(n_tiles_m * 3 * hidden * dim * w_bytes
                           + m_pad * dim * (x_bytes + o_bytes)),
    )

    out2d = pl.pallas_call(
        _ffn_kernel,
        out_shape=jax.ShapeDtypeStruct((m_pad, dim), x.dtype),
        grid_spec=pltpu.PrefetchScalarGridSpec(
            num_scalar_prefetch=0,
            grid=(n_tiles_m, nk),  # token axis first (parallel), hidden last (reduction)
            in_specs=[
                pl.BlockSpec((tm, dim), lambda i, k: (i, 0)),
                _weight_spec((dim, 2 * tk_h), lambda i, k: (0, k)),
                _weight_spec((tk_h, dim), lambda i, k: (k, 0)),
            ],
            out_specs=pl.BlockSpec((tm, dim), lambda i, k: (i, 0)),
            scratch_shapes=[pltpu.VMEM((tm, dim), jnp.float32)],
        ),
        compiler_params=pltpu.CompilerParams(
            dimension_semantics=("parallel", "arbitrary"),
            vmem_limit_bytes=vmem_limit,
        ),
        cost_estimate=cost,
    )(x2d, weights.w_gu, weights.w_d_t)

    if m_pad != m:
        out2d = out2d[:m]
    return out2d.reshape(orig_shape)


def feed_forward_from_linear_weights(x, w_gate, w_up, w_down, *, tm=None, tk_h=None):
    """Convenience path directly from PyTorch-layout (out, in) weights.  For
    production, call prepare_ffn_weights() once and reuse its output."""
    weights = prepare_ffn_weights(w_gate, w_up, w_down, tk_h=tk_h)
    return feed_forward(x, weights, tm=tm)


# ----------------------------------------------------------------------------
# Self-test
# ----------------------------------------------------------------------------
if __name__ == "__main__":
    # Small synthetic config consistent with the module:
    #   dim = 32, ffn_hidden_dim = 64, batch = 2, seq = 8
    batch, seq, dim, hidden = 2, 8, 32, 64

    key = jax.random.PRNGKey(0)
    kx, kg, ku, kd = jax.random.split(key, 4)

    x = jax.random.normal(kx, (batch, seq, dim), dtype=jnp.float32)
    # PyTorch nn.Linear weight layout is (out_features, in_features), no bias.
    w_gate = jax.random.normal(kg, (hidden, dim), dtype=jnp.float32) * 0.05
    w_up = jax.random.normal(ku, (hidden, dim), dtype=jnp.float32) * 0.05
    w_down = jax.random.normal(kd, (dim, hidden), dtype=jnp.float32) * 0.05

    out = feed_forward_from_linear_weights(x, w_gate, w_up, w_down)
    out = jax.block_until_ready(out)

    # Pure-JAX reference (same semantics as the PyTorch forward).
    g = x @ w_gate.T
    ref = (jax.nn.silu(g) * (x @ w_up.T)) @ w_down.T
    assert out.shape == x.shape
    assert jnp.allclose(out, ref, atol=1e-3, rtol=1e-2), float(
        jnp.max(jnp.abs(out - ref)))

    print("KERNEL_OK")
</pallas_src>

<mosaic_0001>
module attributes {stable_mosaic.version = 11 : i64} {
  func.func @_ffn_kernel(%arg0: i32, %arg1: i32, %arg2: memref<16x32xf32, #tpu.memory_space<vmem>>, %arg3: memref<32x128xf32, #tpu.memory_space<vmem>>, %arg4: memref<64x32xf32, #tpu.memory_space<vmem>>, %arg5: memref<16x32xf32, #tpu.memory_space<vmem>>, %arg6: memref<16x32xf32, #tpu.memory_space<vmem>>) attributes {dimension_semantics = [#tpu.dimension_semantics<parallel>, #tpu.dimension_semantics<arbitrary>], iteration_bounds = array<i64: 1, 1>, scalar_prefetch = 0 : i64, scratch_operands = 1 : i64, tpu.core_type = #tpu.core_type<tc>, window_params = [{transform_indices = @transform_0, window_bounds = array<i64: 16, 32>}, {transform_indices = @transform_1, window_bounds = array<i64: 32, 128>}, {transform_indices = @transform_2, window_bounds = array<i64: 64, 32>}, {transform_indices = @transform_3, window_bounds = array<i64: 16, 32>}]} {
    %c0_i32 = arith.constant 0 : i32
    %0 = arith.cmpi eq, %arg1, %c0_i32 : i32
    %1 = arith.extui %0 : i1 to i32
    %c0_i32_0 = arith.constant 0 : i32
    %2 = arith.cmpi ne, %1, %c0_i32_0 : i32
    scf.if %2 {
      %cst_14 = arith.constant 0.000000e+00 : f32
      %23 = vector.broadcast %cst_14 : f32 to vector<16x32xf32>
      %c0_15 = arith.constant 0 : index
      %c0_16 = arith.constant 0 : index
      %24 = vector.load %arg6[%c0_15, %c0_16] : memref<16x32xf32, #tpu.memory_space<vmem>>, vector<16x32xf32>
      tpu.vector_store %arg6[%c0_15, %c0_16], %23 {strides = array<i32>} : memref<16x32xf32, #tpu.memory_space<vmem>>, vector<16x32xf32>,
    } else {
    }
    %c0 = arith.constant 0 : index
    %c0_1 = arith.constant 0 : index
    %3 = vector.load %arg2[%c0, %c0_1] : memref<16x32xf32, #tpu.memory_space<vmem>>, vector<16x32xf32>
    %c0_2 = arith.constant 0 : index
    %c0_3 = arith.constant 0 : index
    %4 = vector.load %arg3[%c0_2, %c0_3] : memref<32x128xf32, #tpu.memory_space<vmem>>, vector<32x128xf32>
    %cst = arith.constant dense<0.000000e+00> : vector<16x128xf32>
    %5 = tpu.matmul %3, %4, %cst {dimension_numbers = #tpu.dot_dimension_numbers<[1], [0], [0], [1], [0, 0, 1, 1], [], []>} : vector<16x32xf32>, vector<32x128xf32>, vector<16x128xf32> -> vector<16x128xf32>
    %6 = vector.extract_strided_slice %5 {offsets = [0, 0], sizes = [16, 64], strides = [1, 1]} : vector<16x128xf32> to vector<16x64xf32>
    %7 = vector.extract_strided_slice %5 {offsets = [0, 64], sizes = [16, 64], strides = [1, 1]} : vector<16x128xf32> to vector<16x64xf32>
    %8 = arith.negf %6 : vector<16x64xf32>
    %9 = math.exp %8 : vector<16x64xf32>
    %cst_4 = arith.constant 1.000000e+00 : f32
    %10 = vector.broadcast %cst_4 : f32 to vector<16x64xf32>
    %11 = arith.addf %10, %9 : vector<16x64xf32>
    %12 = arith.divf %10, %11 : vector<16x64xf32>
    %13 = arith.mulf %6, %12 : vector<16x64xf32>
    %14 = arith.mulf %13, %7 : vector<16x64xf32>
    %c0_5 = arith.constant 0 : index
    %c0_6 = arith.constant 0 : index
    %15 = vector.load %arg6[%c0_5, %c0_6] : memref<16x32xf32, #tpu.memory_space<vmem>>, vector<16x32xf32>
    %c0_7 = arith.constant 0 : index
    %c0_8 = arith.constant 0 : index
    %16 = vector.load %arg4[%c0_7, %c0_8] : memref<64x32xf32, #tpu.memory_space<vmem>>, vector<64x32xf32>
    %cst_9 = arith.constant dense<0.000000e+00> : vector<16x32xf32>
    %17 = tpu.matmul %14, %16, %cst_9 {dimension_numbers = #tpu.dot_dimension_numbers<[1], [0], [0], [1], [0, 0, 1, 1], [], []>} : vector<16x64xf32>, vector<64x32xf32>, vector<16x32xf32> -> vector<16x32xf32>
    %18 = arith.addf %15, %17 : vector<16x32xf32>
    %c0_10 = arith.constant 0 : index
    %c0_11 = arith.constant 0 : index
    %19 = vector.load %arg6[%c0_10, %c0_11] : memref<16x32xf32, #tpu.memory_space<vmem>>, vector<16x32xf32>
    tpu.vector_store %arg6[%c0_10, %c0_11], %18 {strides = array<i32>} : memref<16x32xf32, #tpu.memory_space<vmem>>, vector<16x32xf32>,
    %c0_i32_12 = arith.constant 0 : i32
    %20 = arith.cmpi eq, %arg1, %c0_i32_12 : i32
    %21 = arith.extui %20 : i1 to i32
    %c0_i32_13 = arith.constant 0 : i32
    %22 = arith.cmpi ne, %21, %c0_i32_13 : i32
    scf.if %22 {
      %c0_14 = arith.constant 0 : index
      %c0_15 = arith.constant 0 : index
      %23 = vector.load %arg6[%c0_14, %c0_15] : memref<16x32xf32, #tpu.memory_space<vmem>>, vector<16x32xf32>
      %c0_16 = arith.constant 0 : index
      %c0_17 = arith.constant 0 : index
      %24 = vector.load %arg5[%c0_16, %c0_17] : memref<16x32xf32, #tpu.memory_space<vmem>>, vector<16x32xf32>
      tpu.vector_store %arg5[%c0_16, %c0_17], %23 {strides = array<i32>} : memref<16x32xf32, #tpu.memory_space<vmem>>, vector<16x32xf32>,
    } else {
    }
    return
  }
  func.func @transform_0(%arg0: i32, %arg1: i32) -> (i32, i32) {
    %c0_i32 = arith.constant 0 : i32
    %c0_i32_0 = arith.constant 0 : i32
    return %arg0, %c0_i32 : i32, i32
  }
  func.func @transform_1(%arg0: i32, %arg1: i32) -> (i32, i32) {
    %c0_i32 = arith.constant 0 : i32
    %c0_i32_0 = arith.constant 0 : i32
    return %c0_i32, %arg1 : i32, i32
  }
  func.func @transform_2(%arg0: i32, %arg1: i32) -> (i32, i32) {
    %c0_i32 = arith.constant 0 : i32
    %c0_i32_0 = arith.constant 0 : i32
    return %arg1, %c0_i32 : i32, i32
  }
  func.func @transform_3(%arg0: i32, %arg1: i32) -> (i32, i32) {
    %c0_i32 = arith.constant 0 : i32
    %c0_i32_0 = arith.constant 0 : i32
    return %arg0, %c0_i32 : i32, i32
  }
}

</mosaic_0001>

<bundles_post_ra>
// kernel: tpu_custom_call.1
= control target key start
LH: loop header
LB: loop body
LE: loop exit
PB: predicated region body
PF: predicated region fallthrough
CT: control target
= control target key end

     0   :  { %s312_s0 = inlined_call_operand.vmem [shape: f32[16,32], index: 0, kind: input, shape index: {}]   ;;  %s313_s1 = inlined_call_operand.vmem [shape: f32[32,128], index: 1, kind: input, shape index: {}]   ;;  %s314_s2 = inlined_call_operand.vmem [shape: f32[64,32], index: 2, kind: input, shape index: {}]   ;;  %s315_s3 = inlined_call_operand.hbm [shape: f32[16,32], index: 3, kind: output, shape index: {}]  }
   0x1   :  { %v27_v0 = vld [vmem:[%s313_s1 + $0x18] sm:$0xff]  ;;  %v26_v1 = vld [vmem:[%s313_s1 + $0x10] sm:$0xff]  ;;  %v25_v2 = vld [vmem:[%s313_s1 + $0x8] sm:$0xff] }
   0x2   :  { %47 = vmatpush.msra.mxu0 %v27_v0  ;;  %183 = vmatpush.msra.mxu3 %v27_v0 }
   0x3   :  { %8 = vsyncpa [#allocation4], 0  ;;  %v24_v3 = vld [vmem:[%s313_s1] sm:$0xff]  ;;  %vm19_vm0 = vcmask 261120   ;;  %v23_v5 = vld [vmem:[%s312_s0 + $0x8] sm:$0xff]  ;;  %v235_v24 = vmov 0.0  }
   0x4   :  { %48 = vmatpush.msra.mxu0 %v26_v1  ;;  %184 = vmatpush.msra.mxu3 %v26_v1  ;;  %v22_v4 = vld [vmem:[%s312_s0] sm:$0xff]  ;;  %v117_v6 = vld [vmem:[%s314_s2 + $0x38] sm:$0xff]  ;;  %v116_v7 = vld [vmem:[%s314_s2 + $0x30] sm:$0xff]  ;;  %s234_s0 = smov 64   ;;  %21 = vst.msk [vmem:[#allocation2 + $0x8] sm:$0xff] %vm19_vm0, %v235_v24  ;;  %vm118_vm8 = vcmask 523264  }
   0x5   :  { %187 = vmatpush.msra.mxu2 %v117_v6  ;;  %133 = vmatpush.msra.mxu1 %v117_v6  ;;  %v115_v8 = vld [vmem:[%s314_s2 + $0x28] sm:$0xff]  ;;  %v114_v10 = vld [vmem:[%s314_s2 + $0x20] sm:$0xff]  ;;  %v113_v11 = vld [vmem:[%s314_s2 + $0x18] sm:$0xff]  ;;  %20 = vst.msk [vmem:[#allocation2] sm:$0xff] %vm19_vm0, %v235_v24  ;;  %s165_s15 = sshll.u32 %s315_s3, 4  ;;  %s237_s16 = smov 128   ;;  %s166_s15 = int_to_ptr.hbm [resolvable:$true] %s165_s15 }
   0x6   :  { %49 = vmatpush.msra.mxu0 %v25_v2  ;;  %185 = vmatpush.msra.mxu3 %v25_v2  ;;  %v112_v12 = vld [vmem:[%s314_s2 + $0x10] sm:$0xff]  ;;  %v111_v13 = vld [vmem:[%s314_s2 + $0x8] sm:$0xff]  ;;  %v110_v20 = vld [vmem:[%s314_s2] sm:$0xff]  ;;  %s236_s2 = smov [#allocation3]   ;;  %s238_s17 = smov 8  }
   0x7   :  { %188 = vmatpush.msra.mxu2 %v116_v7  ;;  %134 = vmatpush.msra.mxu1 %v116_v7  ;;  %s163_s12 = sshll.u32 %s236_s2, 4  ;;  %s164_s12 = int_to_ptr.vmem [resolvable:$true] %s163_s12 }
   0x8   :  { %50 = vmatpush.msra.mxu0 %v24_v3  ;;  %186 = vmatpush.msra.mxu3 %v24_v3 }
   0x9   :  { %177 = vmatmul.msk.f32.vlgmr.msra.gmra.mxu0 %vm19_vm0, %v22_v4  ;;  %178 = vmatmul.msk.f32.vlgmr.msra.gmra.mxu3 %vm19_vm0, %v23_v5 }
   0xa   :  { %189 = vmatpush.msra.mxu2 %v115_v8  ;;  %135 = vmatpush.msra.mxu1 %v115_v8 }
   0xb   :  { %v109_v49 = vld [vmem:[#allocation2 + $0x8] sm:$0xff] }
   0xc   :  { %190 = vmatpush.msra.mxu2 %v114_v10  ;;  %136 = vmatpush.msra.mxu1 %v114_v10  ;;  %v108_v51 = vld [vmem:[#allocation2] sm:$0xff] }
   0xe   :  { %191 = vmatpush.msra.mxu2 %v113_v11  ;;  %137 = vmatpush.msra.mxu1 %v113_v11 }
  0x10   :  { %192 = vmatpush.msra.mxu2 %v112_v12  ;;  %138 = vmatpush.msra.mxu1 %v112_v12 }
  0x12   :  { %193 = vmatpush.msra.mxu2 %v111_v13  ;;  %139 = vmatpush.msra.mxu1 %v111_v13 }
  0x14   :  { %194 = vmatpush.msra.mxu2 %v110_v20  ;;  %140 = vmatpush.msra.mxu1 %v110_v20 }
  0x86   :  { %v52_v14 = vpop.f32.mrf.mxu0 }
  0x87   :  { %v179_v16 = vmul.f32 -1.442695, %v52_v14 }
  0x8c   :  { %v55_v9 = vpop.f32.mrf.mxu3 }
  0x8d   :  { %102 = vrot.lane.b32.xlu0 %v55_v9, %s234_s0  ;;  %v180_v15 = vmul.f32 -1.442695, %v55_v9 }
  0x8f   :  { %200 = vpow2.f32 %v180_v15 }
  0x90   :  { %202 = vpow2.f32 %v179_v16 }
  0x95   :  { %100 = vrot.lane.b32.xlu0 %v52_v14, %s234_s0  ;;  %v201_v17 = vpop.eup %200 }
  0x96   :  { %v65_v18 = vadd.f32 1.0, %v201_v17  ;;  %v203_v19 = vpop.eup %202 }
  0x97   :  { %v64_v21 = vadd.f32 1.0, %v203_v19 }
  0x98   :  { %204 = vrcp.f32 %v65_v18  ;;  %v92_v31 = vand.u32 2147483648, %v65_v18  ;;  %vm86_vm2 = vweird.f32 %v65_v18  ;;  %v90_v32 = vand.u32 2147483647, %v65_v18 }
  0x99   :  { %206 = vrcp.f32 %v64_v21  ;;  %vm71_vm4 = vweird.f32 %v64_v21  ;;  %v77_v36 = vand.u32 2147483648, %v64_v21  ;;  %v75_v39 = vand.u32 2147483647, %v64_v21 }
  0x9a   :  { %v93_v35 = vor.u32 1.1754944e-38, %v92_v31  ;;  %vm91_vm6 = vcmp.eq.f32.partialorder %v90_v32, 8.507059e+37 }
  0x9b   :  { %v78_v41 = vor.u32 1.1754944e-38, %v77_v36  ;;  %vm76_vm9 = vcmp.eq.f32.partialorder %v75_v39, 8.507059e+37 }
  0x9e   :  { %v205_v22 = vpop.eup %204 }
  0x9f   :  { %v82_v23 = vmul.f32 %v205_v22, %v65_v18  ;;  %v207_v26 = vpop.eup %206  ;;  %vm87_vm1 = vweird.f32 %v205_v22 }
  0xa0   :  { %v67_v27 = vmul.f32 %v207_v26, %v64_v21  ;;  %vm88_vm3 = vmor %vm86_vm2, %vm87_vm1  ;;  %vm72_vm5 = vweird.f32 %v207_v26 }
  0xa1   :  { %v83_v25 = vsub.f32 1.0, %v82_v23  ;;  %vm73_vm7 = vmor %vm71_vm4, %vm72_vm5 }
  0xa2   :  { %v68_v29 = vsub.f32 1.0, %v67_v27 }
  0xa3   :  { %v84_v28 = vmul.f32 %v205_v22, %v83_v25 }
  0xa4   :  { %v69_v33 = vmul.f32 %v207_v26, %v68_v29 }
  0xa5   :  { %v85_v30 = vadd.f32 %v205_v22, %v84_v28 }
  0xa6   :  { %v70_v38 = vadd.f32 %v207_v26, %v69_v33 }
  0xa7   :  { %v89_v34 = vsel %vm88_vm3, %v205_v22, %v85_v30 }
  0xa8   :  { %v94_v37 = vsel %vm91_vm6, %v93_v35, %v89_v34  ;;  %v74_v43 = vsel %vm73_vm7, %v207_v26, %v70_v38 }
  0xa9   :  { %v97_v40 = vmul.f32 %v94_v37, %v55_v9  ;;  %v79_v45 = vsel %vm76_vm9, %v78_v41, %v74_v43 }
  0xaa   :  { %v96_v46 = vmul.f32 %v79_v45, %v52_v14 }
  0xff   :  { %v103_v42 = vpop.permute.xlu0 %102 }
 0x100   :  { %v107_v44 = vmul.f32 %v103_v42, %v97_v40 }
 0x102   :  { %182 = vmatmul.msk.f32.vlgmr.msra.gmra.mxu2 %vm118_vm8, %v107_v44 }
 0x107   :  { %v101_v47 = vpop.permute.xlu0 %100 }
 0x108   :  { %v106_v48 = vmul.f32 %v101_v47, %v96_v46 }
 0x10a   :  { %181 = vmatmul.msk.f32.vlgmr.msra.gmra.mxu1 %vm118_vm8, %v106_v48 }
 0x185   :  { %v145_v50 = vpop.f32.mrf.mxu2 }
 0x186   :  { %v149_v52 = vadd.f32 %v145_v50, %v109_v49 }
 0x187   :  { %v142_v53 = vpop.f32.mrf.mxu1 }
 0x188   :  { %151 = vst.msk [vmem:[#allocation2 + $0x8] sm:$0xff] %vm19_vm0, %v149_v52  ;;  %v148_v54 = vadd.f32 %v142_v53, %v108_v51 }
 0x18a   :  { %150 = vst.msk [vmem:[#allocation2] sm:$0xff] %vm19_vm0, %v148_v54 }
 0x18f   :  { %v156_v55 = vld [vmem:[#allocation2 + $0x8] sm:$0xff] }
 0x190   :  { %158 = vst.msk [vmem:[#allocation3 + $0x8] sm:$0xff] %vm19_vm0, %v156_v55 }
 0x191   :  { %v155_v56 = vld [vmem:[#allocation2] sm:$0xff] }
 0x192   :  { %157 = vst.msk [vmem:[#allocation3] sm:$0xff] %vm19_vm0, %v155_v56 }
 0x193   :  { %171 = dma.vmem_to_hbm [thread:$0]  %s164_s12, 256, %s166_s15, [#allocation4], %s237_s16, %s237_s16, %s238_s17  }
 0x194   :  { %232 = dma.done.wait [#allocation4], 256  }
 0x195   :  { %233 = vsyncadd [#allocation4], 4294967040 }
 0x196   :  { %176 = vsyncpa [#allocation4], 1 }

</bundles_post_ra>
